<compile_context>
chip_gen: v6e
topology: v6e:2x2x1
jax: 0.10.0
libtpu: 0.0.40
codegen_flags: <defaults>
</compile_context>

<pallas_src>
import functools

import jax
import jax.numpy as jnp
import numpy as np
from jax.experimental import pallas as pl
from jax.experimental.pallas import tpu as pltpu


def fused_projection_kernel(x_ref, wz_ref, ws_ref, z_ref, s_ref):
    """z = X @ W_all (emitted bf16), scores = X @ [W a_l | W a_r] (f32).

    One X row-tile load feeds both matmuls; weights are resident (constant
    index_map, tiny vs the row tiles).
    """
    xb = x_ref[...].astype(jnp.bfloat16)
    z_ref[...] = jnp.dot(
        xb, wz_ref[...], preferred_element_type=jnp.float32
    ).astype(jnp.bfloat16)
    s_ref[...] = jnp.dot(xb, ws_ref[...], preferred_element_type=jnp.float32)


def gat_attention_kernel(el_ref, er_ref, z_ref, adj_ref, out_ref, acc_ref, *,
                         num_heads):
    """Masked softmax over neighbors + attention-weighted aggregation.

    Grid = (row_tiles [parallel], heads [arbitrary]).  adj row tile and the full
    z slab are resident across the head loop (block indices constant over the
    inner axis); the head-sum lives in a VMEM accumulator and is turned into the
    head mean at the last head.
    """
    h = pl.program_id(1)

    @pl.when(h == 0)
    def _():
        acc_ref[...] = jnp.zeros_like(acc_ref)

    el = el_ref[0]                                   # [TILE_N, 1] f32
    er = er_ref[0]                                   # [1, N]      f32
    e = el + er                                      # [TILE_N, N]
    e = jnp.maximum(e, 0.2 * e)                      # LeakyReLU(0.2)

    # int8 mask used directly (no full-tile cast); masked logits are -1e30 so
    # exp underflows to exactly 0 after the max-subtract (self-loops assumed,
    # so every row has at least one finite entry and denom > 0).
    e = jnp.where(adj_ref[...] != 0, e, jnp.float32(-1e30))
    e = e - jnp.max(e, axis=-1, keepdims=True)
    p = jnp.exp(e)
    denom = jnp.sum(p, axis=-1, keepdims=True)

    # Deferred normalization: scale the skinny (TILE_N, F_out) matmul result,
    # not the full (TILE_N, N) probability tile.
    agg = jnp.dot(p.astype(jnp.bfloat16), z_ref[h],
                  preferred_element_type=jnp.float32)
    acc_ref[...] += pl.reciprocal(denom, approx=True) * agg

    @pl.when(h == num_heads - 1)
    def _():
        out_ref[...] = (acc_ref[...] * (1.0 / num_heads)).astype(out_ref.dtype)


def attnet_t_forward(features, adj, w, attn_l, attn_r, *, tile_n=None):
    """ATTNET_t.forward(graph, features) -> net(features) via two Pallas kernels.

    `adj` should be passed as an int8 {0,1} mask with self-loops on the diagonal
    (rows with no neighbors at all would produce a 0 softmax denominator).
    """
    n, f_in = features.shape
    h, _, f_out = w.shape

    if tile_n is None:
        # v5e/v6e (128 MiB VMEM): 256-512 is a good default.  v7x (64 MiB): use
        # 128 for large N, or the column-tiled online-softmax variant.
        tile_n = n if n <= 256 else 256
    assert n % tile_n == 0 and tile_n % 8 == 0, "pad N to a multiple of tile_n"

    if adj.dtype != jnp.int8:
        # Fallback only — prefer passing the int8 mask (avoids an O(N^2) XLA
        # pass on every forward call for a fixed graph).
        adj = (adj > 0).astype(jnp.int8)

    # ---- parameter-only fusion (tiny, done once, outside the kernels) ----------
    # W_all[f, h*F_out+o] = W[h, f, o];  wa_l[f, h] = sum_o W[h,f,o] * a_l[h,o]
    w_all = jnp.transpose(w, (1, 0, 2)).reshape(f_in, h * f_out).astype(jnp.bfloat16)
    wa_l = jnp.einsum('hio,ho->ih', w, attn_l)
    wa_r = jnp.einsum('hio,ho->ih', w, attn_r)
    w_score = jnp.concatenate([wa_l, wa_r], axis=1).astype(jnp.bfloat16)  # [F_in, 2H]

    # ---- kernel 1: fused head-wide projection, bf16 z handoff ------------------
    z_flat, scores = pl.pallas_call(
        fused_projection_kernel,
        out_shape=(
            jax.ShapeDtypeStruct((n, h * f_out), jnp.bfloat16),   # z (bf16 handoff)
            jax.ShapeDtypeStruct((n, 2 * h), jnp.float32),        # [el | er] scores
        ),
        grid_spec=pltpu.PrefetchScalarGridSpec(
            num_scalar_prefetch=0,
            grid=(n // tile_n,),
            in_specs=[
                pl.BlockSpec((tile_n, f_in), lambda r: (r, 0)),       # X row tile
                pl.BlockSpec((f_in, h * f_out), lambda r: (0, 0)),    # W_all (resident)
                pl.BlockSpec((f_in, 2 * h), lambda r: (0, 0)),        # score weights
            ],
            out_specs=(
                pl.BlockSpec((tile_n, h * f_out), lambda r: (r, 0)),
                pl.BlockSpec((tile_n, 2 * h), lambda r: (r, 0)),
            ),
        ),
        compiler_params=pltpu.CompilerParams(
            dimension_semantics=("parallel",)),
    )(features, w_all, w_score)

    # ---- layout plumbing (z transpose now done at bf16 width) ------------------
    z = jnp.transpose(z_flat.reshape(n, h, f_out), (1, 0, 2))         # [H, N, F_out] bf16
    el = jnp.transpose(scores[:, :h])[:, :, None]                     # [H, N, 1] f32
    er = jnp.transpose(scores[:, h:])[:, None, :]                     # [H, 1, N] f32

    # ---- VMEM budget for kernel 2 (resident z + adj tiles + softmax temps) -----
    vmem_est = (
        2 * h * n * f_out * 2          # resident z slab (bf16, allow double buffer)
        + 2 * tile_n * n               # adj int8 row tiles (double buffered)
        + 3 * tile_n * n * 4           # f32 softmax temporaries (e, p, selects)
        + 4 * (tile_n + n) * 4         # el / er blocks
        + 4 * tile_n * f_out * 4       # accumulator + output buffers
    )
    vmem_limit = max(32 * 1024 * 1024, int(vmem_est * 1.3))

    # ---- kernel 2: row-tiled masked softmax + aggregation, head accumulation ---
    kernel = functools.partial(gat_attention_kernel, num_heads=h)
    out = pl.pallas_call(
        kernel,
        out_shape=jax.ShapeDtypeStruct((n, f_out), jnp.float32),
        grid_spec=pltpu.PrefetchScalarGridSpec(
            num_scalar_prefetch=0,
            grid=(n // tile_n, h),
            in_specs=[
                pl.BlockSpec((1, tile_n, 1), lambda r, j: (j, r, 0)),   # el per head/row-tile
                pl.BlockSpec((1, 1, n), lambda r, j: (j, 0, 0)),        # er per head
                pl.BlockSpec((h, n, f_out), lambda r, j: (0, 0, 0)),    # z: fully resident
                pl.BlockSpec((tile_n, n), lambda r, j: (r, 0)),         # adj row tile (int8)
            ],
            out_specs=pl.BlockSpec((tile_n, f_out), lambda r, j: (r, 0)),
            scratch_shapes=[pltpu.VMEM((tile_n, f_out), jnp.float32)],
        ),
        compiler_params=pltpu.CompilerParams(
            dimension_semantics=("parallel", "arbitrary"),
            vmem_limit_bytes=vmem_limit,
        ),
    )(el, er, z, adj)
    return out


def attnet_t_reference(features, adj, w, attn_l, attn_r):
    """Pure-JAX f32 reference of the same GAT forward (for verification)."""
    h = w.shape[0]
    mask = adj > 0
    outs = []
    for i in range(h):
        z = features @ w[i]                                       # [N, F_out]
        el = jnp.sum(z * attn_l[i][None, :], axis=-1, keepdims=True)
        er = jnp.sum(z * attn_r[i][None, :], axis=-1, keepdims=True)
        e = el + er.T
        e = jnp.where(e > 0, e, 0.2 * e)
        e = jnp.where(mask, e, -1e30)
        e = e - jnp.max(e, axis=-1, keepdims=True)
        p = jnp.where(mask, jnp.exp(e), 0.0)
        alpha = p / jnp.sum(p, axis=-1, keepdims=True)
        outs.append(alpha @ z)
    return jnp.mean(jnp.stack(outs, axis=0), axis=0)


if __name__ == "__main__":
    # Small shapes consistent with a GAT forward: N nodes, F_in feats,
    # H heads, F_out per-head output dim.
    N, F_IN, H, F_OUT = 16, 32, 4, 8

    key = jax.random.PRNGKey(0)
    k_x, k_adj, k_w, k_al, k_ar = jax.random.split(key, 5)

    features = jax.random.normal(k_x, (N, F_IN), dtype=jnp.float32)

    # Deterministic random undirected graph with self-loops, stored as int8 mask.
    a = jax.random.uniform(k_adj, (N, N)) < 0.3
    adj = (a | a.T | jnp.eye(N, dtype=bool)).astype(jnp.int8)

    # Deterministic parameter init (Glorot-ish scaling).
    w = jax.random.normal(k_w, (H, F_IN, F_OUT), dtype=jnp.float32) * (1.0 / np.sqrt(F_IN))
    attn_l = jax.random.normal(k_al, (H, F_OUT), dtype=jnp.float32) * (1.0 / np.sqrt(F_OUT))
    attn_r = jax.random.normal(k_ar, (H, F_OUT), dtype=jnp.float32) * (1.0 / np.sqrt(F_OUT))

    out = jax.jit(attnet_t_forward)(features, adj, w, attn_l, attn_r)
    out = jax.block_until_ready(out)

    ref = attnet_t_reference(features, adj, w, attn_l, attn_r)
    # Kernels feed the MXU bf16 operands (f32 accumulation) and use the approx
    # EUP reciprocal, so compare against the f32 reference with a relaxed
    # tolerance — intentional precision trade-off for GAT inference.
    np.testing.assert_allclose(np.asarray(out), np.asarray(ref), rtol=5e-2, atol=5e-2)

    # TODO(synk): ATTNET_t.observe / get_attrib compute edge-gradient attributions
    # via torch.autograd.grad; that backward-pass attribution has no forward-kernel
    # equivalent and is intentionally not implemented here.
    print("KERNEL_OK")
</pallas_src>

<mosaic_0001>
module attributes {stable_mosaic.version = 11 : i64} {
  func.func @fused_projection_kernel(%arg0: i32, %arg1: memref<16x32xf32, #tpu.memory_space<vmem>>, %arg2: memref<32x32xbf16, #tpu.memory_space<vmem>>, %arg3: memref<32x8xbf16, #tpu.memory_space<vmem>>, %arg4: memref<16x32xbf16, #tpu.memory_space<vmem>>, %arg5: memref<16x8xf32, #tpu.memory_space<vmem>>) attributes {dimension_semantics = [#tpu.dimension_semantics<parallel>], iteration_bounds = array<i64: 1>, scalar_prefetch = 0 : i64, scratch_operands = 0 : i64, tpu.core_type = #tpu.core_type<tc>, window_params = [{transform_indices = @transform_0, window_bounds = array<i64: 16, 32>}, {pipeline_mode = #tpu.pipeline_mode<synchronous>, transform_indices = @transform_1, window_bounds = array<i64: 32, 32>}, {pipeline_mode = #tpu.pipeline_mode<synchronous>, transform_indices = @transform_2, window_bounds = array<i64: 32, 8>}, {transform_indices = @transform_3, window_bounds = array<i64: 16, 32>}, {transform_indices = @transform_4, window_bounds = array<i64: 16, 8>}]} {
    %c0 = arith.constant 0 : index
    %c0_0 = arith.constant 0 : index
    %0 = vector.load %arg1[%c0, %c0_0] : memref<16x32xf32, #tpu.memory_space<vmem>>, vector<16x32xf32>
    %1 = arith.truncf %0 : vector<16x32xf32> to vector<16x32xbf16>
    %c0_1 = arith.constant 0 : index
    %c0_2 = arith.constant 0 : index
    %2 = vector.load %arg2[%c0_1, %c0_2] : memref<32x32xbf16, #tpu.memory_space<vmem>>, vector<32x32xbf16>
    %cst = arith.constant dense<0.000000e+00> : vector<16x32xf32>
    %3 = tpu.matmul %1, %2, %cst {dimension_numbers = #tpu.dot_dimension_numbers<[1], [0], [0], [1], [0, 0, 1, 1], [], []>} : vector<16x32xbf16>, vector<32x32xbf16>, vector<16x32xf32> -> vector<16x32xf32>
    %4 = arith.truncf %3 : vector<16x32xf32> to vector<16x32xbf16>
    %c0_3 = arith.constant 0 : index
    %c0_4 = arith.constant 0 : index
    %5 = vector.load %arg4[%c0_3, %c0_4] : memref<16x32xbf16, #tpu.memory_space<vmem>>, vector<16x32xbf16>
    tpu.vector_store %arg4[%c0_3, %c0_4], %4 {strides = array<i32>} : memref<16x32xbf16, #tpu.memory_space<vmem>>, vector<16x32xbf16>,
    %c0_5 = arith.constant 0 : index
    %c0_6 = arith.constant 0 : index
    %6 = vector.load %arg3[%c0_5, %c0_6] : memref<32x8xbf16, #tpu.memory_space<vmem>>, vector<32x8xbf16>
    %cst_7 = arith.constant dense<0.000000e+00> : vector<16x8xf32>
    %7 = tpu.matmul %1, %6, %cst_7 {dimension_numbers = #tpu.dot_dimension_numbers<[1], [0], [0], [1], [0, 0, 1, 1], [], []>} : vector<16x32xbf16>, vector<32x8xbf16>, vector<16x8xf32> -> vector<16x8xf32>
    %c0_8 = arith.constant 0 : index
    %c0_9 = arith.constant 0 : index
    %8 = vector.load %arg5[%c0_8, %c0_9] : memref<16x8xf32, #tpu.memory_space<vmem>>, vector<16x8xf32>
    tpu.vector_store %arg5[%c0_8, %c0_9], %7 {strides = array<i32>} : memref<16x8xf32, #tpu.memory_space<vmem>>, vector<16x8xf32>,
    return
  }
  func.func @transform_0(%arg0: i32) -> (i32, i32) {
    %c0_i32 = arith.constant 0 : i32
    %c0_i32_0 = arith.constant 0 : i32
    return %arg0, %c0_i32 : i32, i32
  }
  func.func @transform_1(%arg0: i32) -> (i32, i32) {
    %c0_i32 = arith.constant 0 : i32
    %c0_i32_0 = arith.constant 0 : i32
    %c0_i32_1 = arith.constant 0 : i32
    return %c0_i32, %c0_i32_0 : i32, i32
  }
  func.func @transform_2(%arg0: i32) -> (i32, i32) {
    %c0_i32 = arith.constant 0 : i32
    %c0_i32_0 = arith.constant 0 : i32
    %c0_i32_1 = arith.constant 0 : i32
    return %c0_i32, %c0_i32_0 : i32, i32
  }
  func.func @transform_3(%arg0: i32) -> (i32, i32) {
    %c0_i32 = arith.constant 0 : i32
    %c0_i32_0 = arith.constant 0 : i32
    return %arg0, %c0_i32 : i32, i32
  }
  func.func @transform_4(%arg0: i32) -> (i32, i32) {
    %c0_i32 = arith.constant 0 : i32
    %c0_i32_0 = arith.constant 0 : i32
    return %arg0, %c0_i32 : i32, i32
  }
}

module attributes {stable_mosaic.version = 11 : i64} {
  func.func @gat_attention_kernel(%arg0: i32, %arg1: i32, %arg2: memref<1x16x1xf32, #tpu.memory_space<vmem>>, %arg3: memref<1x1x16xf32, #tpu.memory_space<vmem>>, %arg4: memref<4x16x8xbf16, #tpu.memory_space<vmem>>, %arg5: memref<16x16xi8, #tpu.memory_space<vmem>>, %arg6: memref<16x8xf32, #tpu.memory_space<vmem>>, %arg7: memref<16x8xf32, #tpu.memory_space<vmem>>) attributes {dimension_semantics = [#tpu.dimension_semantics<parallel>, #tpu.dimension_semantics<arbitrary>], iteration_bounds = array<i64: 1, 4>, scalar_prefetch = 0 : i64, scratch_operands = 1 : i64, tpu.core_type = #tpu.core_type<tc>, window_params = [{transform_indices = @transform_0, window_bounds = array<i64: 1, 16, 1>}, {transform_indices = @transform_1, window_bounds = array<i64: 1, 1, 16>}, {pipeline_mode = #tpu.pipeline_mode<synchronous>, transform_indices = @transform_2, window_bounds = array<i64: 4, 16, 8>}, {transform_indices = @transform_3, window_bounds = array<i64: 16, 16>}, {transform_indices = @transform_4, window_bounds = array<i64: 16, 8>}]} {
    %c0_i32 = arith.constant 0 : i32
    %0 = arith.cmpi eq, %arg1, %c0_i32 : i32
    %1 = arith.extui %0 : i1 to i32
    %c0_i32_0 = arith.constant 0 : i32
    %2 = arith.cmpi ne, %1, %c0_i32_0 : i32
    scf.if %2 {
      %cst_19 = arith.constant 0.000000e+00 : f32
      %39 = vector.broadcast %cst_19 : f32 to vector<16x8xf32>
      %c0_20 = arith.constant 0 : index
      %c0_21 = arith.constant 0 : index
      %40 = vector.load %arg7[%c0_20, %c0_21] : memref<16x8xf32, #tpu.memory_space<vmem>>, vector<16x8xf32>
      tpu.vector_store %arg7[%c0_20, %c0_21], %39 {strides = array<i32>} : memref<16x8xf32, #tpu.memory_space<vmem>>, vector<16x8xf32>,
    } else {
    }
    %c0 = arith.constant 0 : index
    %c0_1 = arith.constant 0 : index
    %c0_2 = arith.constant 0 : index
    %3 = vector.load %arg2[%c0, %c0_1, %c0_2] : memref<1x16x1xf32, #tpu.memory_space<vmem>>, vector<1x16x1xf32>
    %4 = vector.shape_cast %3 : vector<1x16x1xf32> to vector<16x1xf32>
    %c0_3 = arith.constant 0 : index
    %c0_4 = arith.constant 0 : index
    %c0_5 = arith.constant 0 : index
    %5 = vector.load %arg3[%c0_3, %c0_4, %c0_5] : memref<1x1x16xf32, #tpu.memory_space<vmem>>, vector<1x1x16xf32>
    %6 = vector.shape_cast %5 : vector<1x1x16xf32> to vector<1x16xf32>
    %7 = vector.broadcast %4 : vector<16x1xf32> to vector<16x16xf32>
    %8 = vector.broadcast %6 : vector<1x16xf32> to vector<16x16xf32>
    %9 = arith.addf %7, %8 : vector<16x16xf32>
    %cst = arith.constant 2.000000e-01 : f32
    %10 = vector.broadcast %cst : f32 to vector<16x16xf32>
    %11 = arith.mulf %10, %9 : vector<16x16xf32>
    %12 = arith.maximumf %9, %11 : vector<16x16xf32>
    %c0_6 = arith.constant 0 : index
    %c0_7 = arith.constant 0 : index
    %13 = vector.load %arg5[%c0_6, %c0_7] : memref<16x16xi8, #tpu.memory_space<vmem>>, vector<16x16xi8>
    %c0_i8 = arith.constant 0 : i8
    %14 = vector.broadcast %c0_i8 : i8 to vector<16x16xi8>
    %15 = arith.cmpi ne, %13, %14 : vector<16x16xi8>
    %cst_8 = arith.constant -1.000000e+30 : f32
    %16 = vector.broadcast %cst_8 : f32 to vector<16x16xf32>
    %17 = arith.select %15, %12, %16 : vector<16x16xi1>, vector<16x16xf32>
    %cst_9 = arith.constant dense<0xFF800000> : vector<16xf32>
    %18 = vector.multi_reduction <maximumf>, %17, %cst_9 [1] : vector<16x16xf32> to vector<16xf32>
    %19 = vector.shape_cast %18 : vector<16xf32> to vector<16x1xf32>
    %20 = vector.broadcast %19 : vector<16x1xf32> to vector<16x16xf32>
    %21 = arith.subf %17, %20 : vector<16x16xf32>
    %22 = math.exp %21 : vector<16x16xf32>
    %cst_10 = arith.constant dense<0.000000e+00> : vector<16xf32>
    %23 = vector.multi_reduction <add>, %22, %cst_10 [1] : vector<16x16xf32> to vector<16xf32>
    %24 = vector.shape_cast %23 : vector<16xf32> to vector<16x1xf32>
    %25 = arith.truncf %22 : vector<16x16xf32> to vector<16x16xbf16>
    %26 = arith.index_cast %arg1 : i32 to index
    %c0_11 = arith.constant 0 : index
    %c0_12 = arith.constant 0 : index
    %27 = vector.load %arg4[%26, %c0_11, %c0_12] : memref<4x16x8xbf16, #tpu.memory_space<vmem>>, vector<1x16x8xbf16>
    %28 = vector.shape_cast %27 : vector<1x16x8xbf16> to vector<16x8xbf16>
    %cst_13 = arith.constant dense<0.000000e+00> : vector<16x8xf32>
    %29 = tpu.matmul %25, %28, %cst_13 {dimension_numbers = #tpu.dot_dimension_numbers<[1], [0], [0], [1], [0, 0, 1, 1], [], []>} : vector<16x16xbf16>, vector<16x8xbf16>, vector<16x8xf32> -> vector<16x8xf32>
    %c0_14 = arith.constant 0 : index
    %c0_15 = arith.constant 0 : index
    %30 = vector.load %arg7[%c0_14, %c0_15] : memref<16x8xf32, #tpu.memory_space<vmem>>, vector<16x8xf32>
    %31 = tpu.reciprocal %24 {approx = true} : vector<16x1xf32> -> vector<16x1xf32>
    %32 = vector.broadcast %31 : vector<16x1xf32> to vector<16x8xf32>
    %33 = arith.mulf %32, %29 : vector<16x8xf32>
    %34 = arith.addf %30, %33 : vector<16x8xf32>
    %c0_16 = arith.constant 0 : index
    %c0_17 = arith.constant 0 : index
    %35 = vector.load %arg7[%c0_16, %c0_17] : memref<16x8xf32, #tpu.memory_space<vmem>>, vector<16x8xf32>
    tpu.vector_store %arg7[%c0_16, %c0_17], %34 {strides = array<i32>} : memref<16x8xf32, #tpu.memory_space<vmem>>, vector<16x8xf32>,
    %c3_i32 = arith.constant 3 : i32
    %36 = arith.cmpi eq, %arg1, %c3_i32 : i32
    %37 = arith.extui %36 : i1 to i32
    %c0_i32_18 = arith.constant 0 : i32
    %38 = arith.cmpi ne, %37, %c0_i32_18 : i32
    scf.if %38 {
      %c0_19 = arith.constant 0 : index
      %c0_20 = arith.constant 0 : index
      %39 = vector.load %arg7[%c0_19, %c0_20] : memref<16x8xf32, #tpu.memory_space<vmem>>, vector<16x8xf32>
      %cst_21 = arith.constant 2.500000e-01 : f32
      %40 = vector.broadcast %cst_21 : f32 to vector<16x8xf32>
      %41 = arith.mulf %39, %40 : vector<16x8xf32>
      %c0_22 = arith.constant 0 : index
      %c0_23 = arith.constant 0 : index
      %42 = vector.load %arg6[%c0_22, %c0_23] : memref<16x8xf32, #tpu.memory_space<vmem>>, vector<16x8xf32>
      tpu.vector_store %arg6[%c0_22, %c0_23], %41 {strides = array<i32>} : memref<16x8xf32, #tpu.memory_space<vmem>>, vector<16x8xf32>,
    } else {
    }
    return
  }
  func.func @transform_0(%arg0: i32, %arg1: i32) -> (i32, i32, i32) {
    %c0_i32 = arith.constant 0 : i32
    %c0_i32_0 = arith.constant 0 : i32
    return %arg1, %arg0, %c0_i32 : i32, i32, i32
  }
  func.func @transform_1(%arg0: i32, %arg1: i32) -> (i32, i32, i32) {
    %c0_i32 = arith.constant 0 : i32
    %c0_i32_0 = arith.constant 0 : i32
    %c0_i32_1 = arith.constant 0 : i32
    return %arg1, %c0_i32, %c0_i32_0 : i32, i32, i32
  }
  func.func @transform_2(%arg0: i32, %arg1: i32) -> (i32, i32, i32) {
    %c0_i32 = arith.constant 0 : i32
    %c0_i32_0 = arith.constant 0 : i32
    %c0_i32_1 = arith.constant 0 : i32
    %c0_i32_2 = arith.constant 0 : i32
    return %c0_i32, %c0_i32_0, %c0_i32_1 : i32, i32, i32
  }
  func.func @transform_3(%arg0: i32, %arg1: i32) -> (i32, i32) {
    %c0_i32 = arith.constant 0 : i32
    %c0_i32_0 = arith.constant 0 : i32
    return %arg0, %c0_i32 : i32, i32
  }
  func.func @transform_4(%arg0: i32, %arg1: i32) -> (i32, i32) {
    %c0_i32 = arith.constant 0 : i32
    %c0_i32_0 = arith.constant 0 : i32
    return %arg0, %c0_i32 : i32, i32
  }
}

</mosaic_0001>

<bundles_post_ra>
// kernel: attnet_t_forward.3
= control target key start
LH: loop header
LB: loop body
LE: loop exit
PB: predicated region body
PF: predicated region fallthrough
CT: control target
= control target key end

     0   :  { %s619_s15 = smov 0   ;;  %s621_s16 = smov 0   ;;  %s683_s0 = inlined_call_operand.vmem [shape: f32[4,16,1], index: 0, kind: input, shape index: {}]   ;;  %s684_s1 = inlined_call_operand.vmem [shape: f32[4,1,16], index: 1, kind: input, shape index: {}]   ;;  %s685_s2 = inlined_call_operand.vmem [shape: bf16[4,16,8], index: 2, kind: input, shape index: {}]   ;;  %s686_s3 = inlined_call_operand.vmem [shape: s8[16,16], index: 3, kind: input, shape index: {}]   ;;  %s687_s4 = inlined_call_operand.vmem [shape: f32[16,8], index: 4, kind: output, shape index: {}]  }
   0x1   :  { %s623_s17 = smov 0  }
   0x2 LB: > { %s23_s18 = sadd.s32 1, %s584_s16  ;;  %p504_p0 = scmp.ge.s32.totalorder %s588_s17, 1  ;;  %s588_s17 = sphi %s623_s17, %s14_s17   ;;  %s584_s16 = sphi %s621_s16, %s689_s16   ;;  %s580_s15 = sphi %s619_s15, %s688_s15  }
   0x3   : > { %p24_p1 = scmp.ge.s32.totalorder %s23_s18, 4  ;;  %p200_p2 = scmp.lt.s32.totalorder %s588_s17, 5 }
   0x5   : > { %s691_s18 = smov (%p24_p1, %s23_s18), 0  ;;  %p201_p3 = pnand %p504_p0, %p200_p2 }
   0x6   : > { %p239_p4 = scmp.lt.s32.totalorder (!%p201_p3), %s580_s15, 3  ;;  %p507_p5 = scmp.ne.s32.totalorder (!%p201_p3), %s580_s15, 0 }
   0x7   : > { %204 = sbr.rel (%p201_p3) target bundleno = 528 (0x210), region = 36 }
   0xc   : > { %s240_s19 = scalar_select %p239_p4, %s580_s15, 3 }
   0xd   : > { %269 = sbr.rel (%p507_p5) target bundleno = 20 (0x14), region = 40 }
   0xe   : > { %s518_s20 = sshll.u32 %s240_s19, 4  ;;  %s250_s23 = scalar_lea.vmem %s684_s1, %s240_s19 }
   0xf   : > { %s246_s26 = scalar_lea.vmem %s683_s0, %s518_s20 }
  0x12   : > { %vm270_vm0 = vcmask 64512   ;;  %v590_v0 = vmov 0.0  }
  0x13   : > { %271 = vst.msk [vmem:[#allocation2] sm:$0xff] %vm270_vm0, %v590_v0  ;;  %272 = vst.msk [vmem:[#allocation2 + $0x8] sm:$0xff] %vm270_vm0, %v590_v0 }
  0x14 PF: > { %v273_v1 = vld [vmem:[%s246_s26] sm:$0xff]  ;;  %v591_v2 = vmov 0   ;;  %v274_v3 = vld [vmem:[%s246_s26 + $0x8] sm:$0xff]  ;;  %vm310_vm4 = vcmask 130048   ;;  %s519_s5 = sshll.u32 %s580_s15, 3  ;;  %v592_v24 = vmov 0.0  }
  0x15   : > { %556 = vset.pattern.permute.xlu0 %v591_v2  ;;  %v298_v4 = vld [vmem:[%s686_s3] sm:$0x3]  ;;  %v299_v5 = vld [vmem:[%s686_s3 + $0x2] sm:$0x3]  ;;  %s332_s8 = scalar_lea.vmem %s685_s2, %s519_s5  ;;  %522 = vmatprep.subr.bf16.mxu0 %v592_v24  ;;  %vm593_vm6 = vmmov 0   ;;  %vm393_vm7 = vcmask 64512  }
  0x16   : > { %278 = vperm.xlu0 %556, %v273_v1   ;;  %vm300_vm1 = vnez %v298_v4  ;;  %v508_v7 = vld [vmem:[%s250_s23] ss:$0 sm:$0xff]  ;;  %vm301_vm2 = vnez %v299_v5  ;;  %524 = vmatprep.mubr.msk.bf16.mxu0 %vm593_vm6, %v592_v24  ;;  %p513_p6 = scmp.ne.s32.totalorder %s580_s15, 3 }
  0x17   : > { %v302_v6 = vsel %vm300_vm1, 16843009, %v591_v2  ;;  %v303_v11 = vsel %vm301_vm2, 16843009, %v591_v2  ;;  %v557_v23 = vld [vmem:[%s332_s8] sm:$0xff]  }
  0x18   : > { %v304_v9 = vunpack.c.0.s8 %v302_v6  ;;  %v305_v14 = vunpack.c.0.s8 %v303_v11  ;;  %523 = vmatpush3.bf16.msra.mxu0 %v557_v23 }
  0x1a   : > { %283 = vperm.xlu0 %556, %v274_v3   ;;  %vm306_vm3 = vcmp.ne.s32.totalorder %v304_v9, 0  ;;  %vm307_vm5 = vcmp.ne.s32.totalorder %v305_v14, 0  ;;  %v385_v40 = vld [vmem:[#allocation2] sm:$0xff]  ;;  %v386_v46 = vld [vmem:[#allocation2 + $0x8] sm:$0xff] }
  0x91   : > { %v279_v8 = vpop.permute.xlu0 %278 }
  0x92   : > { %v292_v10 = vadd.f32 %v508_v7, %v279_v8 }
  0x94   : > { %v294_v12 = vmul.f32 0.2, %v292_v10 }
  0x95   : > { %v284_v13 = vpop.permute.xlu0 %283 }
  0x96   : > { %v296_v15 = vmax.f32 %v292_v10, %v294_v12  ;;  %v293_v16 = vadd.f32 %v508_v7, %v284_v13 }
  0x98   : > { %v295_v17 = vmul.f32 0.2, %v293_v16  ;;  %v308_v18 = vsel %vm306_vm3, %v296_v15, -1e+30 }
  0x99   : > { %v311_v19 = vsel %vm310_vm4, %v308_v18, -inf }
  0x9a   : > { %v297_v20 = vmax.f32 %v293_v16, %v295_v17  ;;  %312 = vmax.xlane.f32.xlu1 %v311_v19 }
  0x9c   : > { %v309_v21 = vsel %vm307_vm5, %v297_v20, -1e+30 }
  0x9d   : > { %v314_v22 = vsel %vm310_vm4, %v309_v21, -inf }
  0x9e   : > { %315 = vmax.xlane.f32.xlu1 %v314_v22 }
 0x123   : > { %v313_v25 = vpop.xlane.xlu1 %312 }
 0x124   : > { %v317_v26 = vsub.f32 %v308_v18, %v313_v25 }
 0x126   : > { %v319_v27 = vmul.f32 1.442695, %v317_v26 }
 0x127   : > { %v316_v28 = vpop.xlane.xlu1 %315 }
 0x128   : > { %558 = vpow2.f32 %v319_v27  ;;  %v318_v29 = vsub.f32 %v309_v21, %v316_v28 }
 0x12a   : > { %v321_v30 = vmul.f32 1.442695, %v318_v29 }
 0x12c   : > { %560 = vpow2.f32 %v321_v30 }
 0x135   : > { %v559_v31 = vpop.eup %558 }
 0x136   : > { %v323_v32 = vsel %vm310_vm4, %v559_v31, 0.0 }
 0x137   : > { %324 = vadd.xlane.f32.xlu0 %v323_v32 }
 0x139   : > { %v561_v33 = vpop.eup %560 }
 0x13a   : > { %v326_v34 = vsel %vm310_vm4, %v561_v33, 0.0  ;;  %v329_v35 = vpack.c.bf16 %v561_v33, %v559_v31 }
 0x13b   : > { %327 = vadd.xlane.f32.xlu1 %v326_v34 }
 0x13c   : > { %525 = vmatmul.mubr.msk.bf16.vlgmr.msra.gmra.mxu0 %vm310_vm4, %v329_v35 }
 0x1c0   : > { %v325_v36 = vpop.xlane.xlu0 %324 }
 0x1c1   : > { %562 = vrcp.f32 %v325_v36 }
 0x1c4   : > { %v328_v37 = vpop.xlane.xlu1 %327 }
 0x1c5   : > { %564 = vrcp.f32 %v328_v37 }
 0x1ce   : > { %v563_v38 = vpop.eup %562 }
 0x1d2   : > { %v565_v44 = vpop.eup %564 }
 0x1fc   : > { %v378_v39 = vpop.f32.mrf.mxu0 }
 0x1fd   : > { %v389_v41 = vmul.f32 %v563_v38, %v378_v39 }
 0x1fe   : > { %v526_v42 = vpop.f32.mrf.mxu0 }
 0x1ff   : > { %v391_v43 = vadd.f32 %v389_v41, %v385_v40 }
 0x200   : > { %v381_v45 = vpop.f32.mrf.mxu0 }
 0x201   : > { %394 = vst.msk [vmem:[#allocation2] sm:$0xff] %vm393_vm7, %v391_v43  ;;  %v390_v47 = vmul.f32 %v565_v44, %v381_v45  ;;  %399 = sbr.rel (%p513_p6) target bundleno = 528 (0x210), region = 44 }
 0x202   : > { %v527_v48 = vpop.f32.mrf.mxu0 }
 0x203   : > { %v392_v49 = vadd.f32 %v390_v47, %v386_v46 }
 0x205   : > { %395 = vst.msk [vmem:[#allocation2 + $0x8] sm:$0xff] %vm393_vm7, %v392_v49 }
 0x208   : > { %v400_v50 = vld [vmem:[#allocation2] sm:$0xff] }
 0x209   : > { %v402_v52 = vmul.f32 0.25, %v400_v50 }
 0x20b   : > { %404 = vst.msk [vmem:[%s687_s4] sm:$0xff] %vm393_vm7, %v402_v52 }
 0x20c   : > { %v401_v51 = vld [vmem:[#allocation2 + $0x8] sm:$0xff] }
 0x20d   : > { %v403_v53 = vmul.f32 0.25, %v401_v51 }
 0x20f   : > { %405 = vst.msk [vmem:[%s687_s4 + $0x8] sm:$0xff] %vm393_vm7, %v403_v53 }
 0x210 PF: > { %s14_s17 = sadd.s32 1, %s588_s17   ;;  %s688_s15 = smov %s584_s16 }
 0x211   : > { %p11_p7 = scmp.ge.s32.totalorder %s14_s17, 6   ;;  %s689_s16 = smov %s691_s18 }
 0x213   :  { %13 = sbr.rel (!%p11_p7) target bundleno = 2 (0x2), region = 81 }

// kernel: attnet_t_forward.2
= control target key start
LH: loop header
LB: loop body
LE: loop exit
PB: predicated region body
PF: predicated region fallthrough
CT: control target
= control target key end

     0   :  { %v198_v0 = vmov 0.0   ;;  %vm199_vm0 = vmmov 0   ;;  %vm36_vm1 = vcmask 261120   ;;  %vm149_vm2 = vcmask 64512   ;;  %s255_s1 = inlined_call_operand.vmem [shape: bf16[32,32], index: 1, kind: input, shape index: {}]   ;;  %s256_s2 = inlined_call_operand.vmem [shape: bf16[32,8], index: 2, kind: input, shape index: {}]   ;;  %s257_s0 = inlined_call_operand.vmem [shape: f32[16,32], index: 0, kind: input, shape index: {}]   ;;  %s258_s4 = inlined_call_operand.vmem [shape: f32[16,8], index: 4, kind: output, shape index: {1}]   ;;  %s259_s3 = inlined_call_operand.vmem [shape: bf16[16,32], index: 3, kind: output, shape index: {0}]  }
   0x1   :  { %176 = vmatprep.subr.bf16.mxu0 %v198_v0  ;;  %184 = vmatprep.subr.bf16.mxu1 %v198_v0  ;;  %v194_v1 = vld [vmem:[%s255_s1 + $0x8] sm:$0xff]   ;;  %v196_v3 = vld [vmem:[%s255_s1] sm:$0xff]   ;;  %vm89_vm3 = vcmask 257024  }
   0x2   :  { %v195_v2 = vld [vmem:[%s256_s2 + $0x8] sm:$0xff]   ;;  %180 = vmatprep.mubr.msk.bf16.mxu0 %vm199_vm0, %v198_v0  ;;  %188 = vmatprep.mubr.msk.bf16.mxu1 %vm199_vm0, %v198_v0  ;;  %v197_v4 = vld [vmem:[%s256_s2] sm:$0xff]  }
   0x3   :  { %177 = vmatpush3.bf16.msra.mxu0 %v194_v1  ;;  %185 = vmatpush3.bf16.msra.mxu1 %v195_v2  ;;  %v17_v5 = vld [vmem:[%s257_s0] sm:$0xff]  ;;  %v18_v6 = vld [vmem:[%s257_s0 + $0x8] sm:$0xff] }
   0x4   :  { %178 = vmatprep.subr.bf16.mxu0 %v198_v0  ;;  %186 = vmatprep.subr.bf16.mxu1 %v198_v0  ;;  %v19_v7 = vpack.c.bf16 %v18_v6, %v17_v5 }
   0x7   :  { %179 = vmatpush3.bf16.msra.mxu0 %v196_v3  ;;  %187 = vmatpush3.bf16.msra.mxu1 %v197_v4 }
   0xa   :  { %181 = vmatmul.mubr.msk.bf16.vlgmr.msra.gmra.mxu0 %vm36_vm1, %v19_v7  ;;  %189 = vmatmul.mubr.msk.bf16.vlgmr.msra.gmra.mxu1 %vm36_vm1, %v19_v7 }
  0xca   :  { %v74_v8 = vpop.f32.mrf.mxu0  ;;  %v142_v10 = vpop.f32.mrf.mxu1 }
  0xcb   :  { %v168_v9 = vpack.c.bf16 %v74_v8, %v74_v8  ;;  %150 = vst.msk [vmem:[%s258_s4] sm:$0xff] %vm149_vm2, %v142_v10 }
  0xcc   :  { %v182_v11 = vpop.f32.mrf.mxu0  ;;  %v190_v12 = vpop.f32.mrf.mxu1 }
  0xcd   :  { %90 = vst.msk [vmem:[%s259_s3] sm:$0xf] %vm89_vm3, %v168_v9 }
  0xce   :  { %v77_v13 = vpop.f32.mrf.mxu0  ;;  %v145_v15 = vpop.f32.mrf.mxu1 }
  0xcf   :  { %v169_v14 = vpack.c.bf16 %v77_v13, %v77_v13  ;;  %151 = vst.msk [vmem:[%s258_s4 + $0x8] sm:$0xff] %vm149_vm2, %v145_v15 }
  0xd0   :  { %v183_v16 = vpop.f32.mrf.mxu0  ;;  %v191_v17 = vpop.f32.mrf.mxu1 }
  0xd1   :  { %91 = vst.msk [vmem:[%s259_s3 + $0x4] sm:$0xf] %vm89_vm3, %v169_v14 }

</bundles_post_ra>
